<compile_context>
chip_gen: v5e
topology: v5e:2x2
jax: 0.10.0
libtpu: 0.0.40
codegen_flags: <defaults>
</compile_context>

<pallas_src>
import functools

import jax
import jax.numpy as jnp
from jax.experimental import pallas as pl
from jax.experimental.pallas import tpu as pltpu


LANE = 128           # vreg lane width / MXU tile width
BF16_SUBLANE = 16    # bf16 packs 16 rows per vreg -> batch tiles multiple of 16

_BATCH_TILES = (512, 256, 128, 64, 32, 16)
_VMEM_TARGET = 48 * 1024 * 1024        # fits v7x (64 MiB physical) with headroom
_VMEM_LIMIT_FLOOR = 32 * 1024 * 1024   # >= every generation's scoped default
_VMEM_LIMIT_CAP = 60 * 1024 * 1024     # never request more than v7x physical


def _round_up(n: int, m: int) -> int:
    return (n + m - 1) // m * m


# --------------------------------------------------------------------------- #
# Tile planning (all static, runs at trace time)
# --------------------------------------------------------------------------- #
def _choose_batch_tile(batch: int, block_batch: int):
    """Pick (tm, B_pad): tm multiple of 16, limited padding, >=2 grid steps."""
    block_batch = max(int(block_batch), BF16_SUBLANE)
    b16 = _round_up(max(batch, 1), BF16_SUBLANE)
    cands = [t for t in _BATCH_TILES if t <= block_batch]

    tm = None
    for t in cands:  # largest tile whose batch-padding overhead is <= 12.5%
        pad = _round_up(b16, t) - b16
        if pad * 8 <= b16:
            tm = t
            break
    if tm is None:   # fall back: minimize padded work, then prefer larger tile
        tm = min(cands, key=lambda t: (_round_up(b16, t), -t))

    b_pad = _round_up(b16, tm)
    # v7x has 2 TensorCores: give the "parallel" axis at least 2 steps.
    if b_pad // tm == 1 and tm > BF16_SUBLANE and (tm // 2) % BF16_SUBLANE == 0 \
            and b_pad % (tm // 2) == 0:
        tm //= 2
    return tm, b_pad


def _vmem_bytes(tm, din_p, t_dh, dout_p, dout_lanes, x_isz, out_isz):
    """Conservative VMEM footprint: every blocked operand double-buffered."""
    db = 2
    return (db * tm * din_p * x_isz            # x tiles
            + db * din_p * t_dh * 2            # w1 tiles (bf16)
            + db * 8 * t_dh * 4                # b1 tiles (sublane-padded f32)
            + db * t_dh * dout_p * 2           # w2 tiles (bf16)
            + db * 8 * dout_lanes * 4          # b2 tiles
            + db * tm * dout_lanes * out_isz   # output tiles
            + tm * dout_p * 4)                 # f32 accumulator scratch


def _choose_hidden_tile(tm, din_p, dh_p, dout_p, dout_lanes, x_isz, out_isz):
    """Largest hidden tile (multiple of 128, divides Dh_p) within the budget."""
    n = dh_p // LANE
    for k in range(1, n + 1):
        if n % k:
            continue
        t_dh = dh_p // k
        if _vmem_bytes(tm, din_p, t_dh, dout_p, dout_lanes,
                       x_isz, out_isz) <= _VMEM_TARGET:
            return t_dh
    return LANE


# --------------------------------------------------------------------------- #
# Kernel
# --------------------------------------------------------------------------- #
def mlp_kernel(x_ref, w1_ref, b1_ref, w2_ref, b2_ref, o_ref, acc_ref):
    """One (batch-tile i, hidden-tile k) grid step of fc2(sigmoid(fc1(x))).

    x_ref  : (tm, Din_p)     bf16 or f32 (cast in-kernel) -- batch tile
    w1_ref : (Din_p, t_dh)   bf16, [in, out] layout, fc1 hidden slice
    b1_ref : (1, t_dh)       f32  (padded hidden columns are EXACTLY zero)
    w2_ref : (t_dh, Dout_p)  bf16, [in, out] layout (padded hidden ROWS are zero)
    b2_ref : (1, Dout)       f32, true (unpadded) output bias
    o_ref  : (tm, Dout)      output tile (lane-unpadded), written on last k
    acc_ref: (tm, Dout_p)    f32 fc2 accumulator scratch, persists across k
    """
    k = pl.program_id(1)

    @pl.when(k == 0)
    def _init():
        acc_ref[...] = jnp.zeros_like(acc_ref)

    x = x_ref[...]
    if x.dtype != jnp.bfloat16:          # cheap VALU cast, hidden under the MXU;
        x = x.astype(jnp.bfloat16)       # avoids a wrapper-side HBM pass over x

    # fc1 slice: bf16 MXU matmul, f32 accumulate; bias + sigmoid in f32 (exp on EUP).
    h = jnp.dot(x, w1_ref[...], preferred_element_type=jnp.float32)
    h = jax.nn.sigmoid(h + b1_ref[...])
    # Padded hidden columns give sigmoid(0 + 0) = 0.5, but the matching w2 rows
    # are exactly zero, so they contribute nothing to real outputs.

    # fc2 partial product over this hidden slice, accumulated in f32.
    acc_ref[...] += jnp.dot(h.astype(jnp.bfloat16), w2_ref[...],
                            preferred_element_type=jnp.float32)

    @pl.when(k == pl.num_programs(1) - 1)
    def _finalize():
        dout = o_ref.shape[-1]
        y = acc_ref[...]                 # (tm, Dout_p) f32
        o_ref[...] = (y[:, :dout] + b2_ref[...]).astype(o_ref.dtype)


# --------------------------------------------------------------------------- #
# One-time parameter packing (hoisted out of the per-call forward)
# --------------------------------------------------------------------------- #
def prepare_params(w1, b1, w2, b2):
    """Pack PyTorch-layout Linear params ONCE for the kernel.

    w1: (Dh, Din), b1: (Dh,), w2: (Dout, Dh), b2: (Dout,)
    Returns (w1_t, b1_p, w2_t, b2_r):
      w1_t: (Din_p, Dh_p)  bf16, transposed to [in, out], zero-padded
      b1_p: (1, Dh_p)      f32, zero-padded
      w2_t: (Dh_p, Dout_p) bf16, transposed to [in, out], zero-padded
      b2_r: (1, Dout)      f32, NOT lane-padded (its width carries the true Dout)

    NOTE: correctness of the lane padding requires b1_p's padded columns and
    w2_t's padded ROWS to be exactly zero (sigmoid(0)=0.5 must multiply zeros).
    Keep the jnp.zeros(...).at[...].set(...) construction if you modify this.
    """
    dh, din = w1.shape
    dout, dh2 = w2.shape
    assert dh2 == dh and b1.shape == (dh,) and b2.shape == (dout,)

    din_p = _round_up(din, LANE)
    dh_p = _round_up(dh, LANE)
    dout_p = _round_up(dout, LANE)

    w1_t = jnp.zeros((din_p, dh_p), jnp.bfloat16).at[:din, :dh].set(
        w1.T.astype(jnp.bfloat16))
    b1_p = jnp.zeros((1, dh_p), jnp.float32).at[0, :dh].set(
        b1.astype(jnp.float32))
    w2_t = jnp.zeros((dh_p, dout_p), jnp.bfloat16).at[:dh, :dout].set(
        w2.T.astype(jnp.bfloat16))
    b2_r = b2.astype(jnp.float32).reshape(1, dout)
    return w1_t, b1_p, w2_t, b2_r


# --------------------------------------------------------------------------- #
# Forward
# --------------------------------------------------------------------------- #
@functools.partial(jax.jit, static_argnames=("block_batch", "out_dtype"))
def neural_network_forward(x, params, *, block_batch=512, out_dtype=jnp.float32):
    """fc2(sigmoid(fc1(x))) with pre-packed params from prepare_params().

    x: (..., Din) float. Returns (..., Dout) in out_dtype (f32 default matches
    the PyTorch module; pass jnp.bfloat16 to halve output HBM writeback).
    """
    w1_t, b1_p, w2_t, b2_r = params
    din_p_full, dh_p = w1_t.shape
    dout_p = w2_t.shape[1]
    dout = b2_r.shape[1]

    lead = x.shape[:-1]
    din = x.shape[-1]
    if _round_up(din, LANE) != din_p_full:
        raise ValueError("x feature dim does not match the packed weights")
    x2 = x.reshape((-1, din))
    batch = x2.shape[0]

    out_isz = jnp.dtype(out_dtype).itemsize
    dout_lanes = _round_up(dout, LANE)

    # --- static tile planning ----------------------------------------------
    tm, b_pad = _choose_batch_tile(batch, block_batch)
    while True:
        pad_x = (din % LANE != 0) or (b_pad != batch)
        din_p = _round_up(din, LANE) if pad_x else din
        x_isz = 2 if pad_x else x2.dtype.itemsize
        t_dh = _choose_hidden_tile(tm, din_p, dh_p, dout_p, dout_lanes,
                                   x_isz, out_isz)
        need = _vmem_bytes(tm, din_p, t_dh, dout_p, dout_lanes, x_isz, out_isz)
        if need <= _VMEM_TARGET or tm <= 64:
            break
        tm //= 2                                    # v5e-friendly fallback
        b_pad = _round_up(_round_up(batch, BF16_SUBLANE), tm)

    vmem_limit = int(max(_VMEM_LIMIT_FLOOR,
                         min(_VMEM_LIMIT_CAP, need * 5 // 4 + (1 << 20))))

    # --- pad/cast x only when actually required -----------------------------
    if pad_x:
        x_in = jnp.zeros((b_pad, din_p), jnp.bfloat16).at[:batch, :din].set(
            x2.astype(jnp.bfloat16))
    else:
        x_in = x2            # no extra HBM pass; bf16 cast happens in-kernel

    grid = (b_pad // tm, dh_p // t_dh)

    out = pl.pallas_call(
        mlp_kernel,
        out_shape=jax.ShapeDtypeStruct((b_pad, dout), out_dtype),
        grid=grid,
        in_specs=[
            pl.BlockSpec((tm, din_p), lambda i, k: (i, 0)),     # x: constant over k
            pl.BlockSpec((din_p, t_dh), lambda i, k: (0, k)),   # w1 hidden slice
            pl.BlockSpec((1, t_dh), lambda i, k: (0, k)),       # b1 hidden slice
            pl.BlockSpec((t_dh, dout_p), lambda i, k: (k, 0)),  # w2 hidden slice
            pl.BlockSpec((1, dout), lambda i, k: (0, 0)),       # b2: resident
        ],
        out_specs=pl.BlockSpec((tm, dout), lambda i, k: (i, 0)),  # lane-unpadded
        scratch_shapes=[pltpu.VMEM((tm, dout_p), jnp.float32)],
        compiler_params=pltpu.CompilerParams(
            dimension_semantics=("parallel", "arbitrary"),
            vmem_limit_bytes=vmem_limit,
        ),
    )(x_in, w1_t, b1_p, w2_t, b2_r)

    if b_pad != batch:
        out = out[:batch]
    return out.reshape(lead + (dout,))


def init_params(key, dim_in, dim_hidden, dim_out):
    """Deterministic PyTorch-style (uniform +-1/sqrt(fan_in)) init."""
    k1, k2, k3, k4 = jax.random.split(key, 4)
    bound1 = 1.0 / jnp.sqrt(dim_in)
    bound2 = 1.0 / jnp.sqrt(dim_hidden)
    w1 = jax.random.uniform(k1, (dim_hidden, dim_in), jnp.float32, -bound1, bound1)
    b1 = jax.random.uniform(k2, (dim_hidden,), jnp.float32, -bound1, bound1)
    w2 = jax.random.uniform(k3, (dim_out, dim_hidden), jnp.float32, -bound2, bound2)
    b2 = jax.random.uniform(k4, (dim_out,), jnp.float32, -bound2, bound2)
    return w1, b1, w2, b2


if __name__ == "__main__":
    # Small shapes consistent with a "catcher" control net.
    batch, dim_in, dim_hidden, dim_out = 8, 4, 32, 3

    key = jax.random.PRNGKey(0)
    kx, kp = jax.random.split(key)
    x = jax.random.normal(kx, (batch, dim_in), jnp.float32)
    w1, b1, w2, b2 = init_params(kp, dim_in, dim_hidden, dim_out)

    params = prepare_params(w1, b1, w2, b2)          # one-time packing (hoisted)
    out = neural_network_forward(x, params)
    out = jax.block_until_ready(out)
    assert out.shape == (batch, dim_out)
    assert out.dtype == jnp.float32

    # Reference 1: precision-matched (bf16 matmuls, f32 accumulate) — tight tol.
    xb = x.astype(jnp.bfloat16)
    h_ref = jax.nn.sigmoid(
        jnp.dot(xb, w1.T.astype(jnp.bfloat16),
                preferred_element_type=jnp.float32) + b1)
    ref_bf16 = jnp.dot(h_ref.astype(jnp.bfloat16), w2.T.astype(jnp.bfloat16),
                       preferred_element_type=jnp.float32) + b2
    assert jnp.allclose(out, ref_bf16, atol=1e-5, rtol=1e-5)

    # Reference 2: pure f32 PyTorch-equivalent math — loose tol (bf16 matmuls).
    ref_f32 = jax.nn.sigmoid(x @ w1.T + b1) @ w2.T + b2
    assert jnp.allclose(out, ref_f32, atol=3e-2, rtol=3e-2)

    print("KERNEL_OK")
</pallas_src>

<mosaic_0001>
module attributes {stable_mosaic.version = 11 : i64} {
  func.func @mlp_kernel(%arg0: i32, %arg1: i32, %arg2: memref<16x128xbf16, #tpu.memory_space<vmem>>, %arg3: memref<128x128xbf16, #tpu.memory_space<vmem>>, %arg4: memref<1x128xf32, #tpu.memory_space<vmem>>, %arg5: memref<128x128xbf16, #tpu.memory_space<vmem>>, %arg6: memref<1x3xf32, #tpu.memory_space<vmem>>, %arg7: memref<16x3xf32, #tpu.memory_space<vmem>>, %arg8: memref<16x128xf32, #tpu.memory_space<vmem>>) attributes {dimension_semantics = [#tpu.dimension_semantics<parallel>, #tpu.dimension_semantics<arbitrary>], iteration_bounds = array<i64: 1, 1>, scalar_prefetch = 0 : i64, scratch_operands = 1 : i64, tpu.core_type = #tpu.core_type<tc>, window_params = [{transform_indices = @transform_0, window_bounds = array<i64: 16, 128>}, {transform_indices = @transform_1, window_bounds = array<i64: 128, 128>}, {transform_indices = @transform_2, window_bounds = array<i64: 1, 128>}, {transform_indices = @transform_3, window_bounds = array<i64: 128, 128>}, {pipeline_mode = #tpu.pipeline_mode<synchronous>, transform_indices = @transform_4, window_bounds = array<i64: 1, 3>}, {transform_indices = @transform_5, window_bounds = array<i64: 16, 3>}]} {
    %c0_i32 = arith.constant 0 : i32
    %0 = arith.cmpi eq, %arg1, %c0_i32 : i32
    %1 = arith.extui %0 : i1 to i32
    %c0_i32_0 = arith.constant 0 : i32
    %2 = arith.cmpi ne, %1, %c0_i32_0 : i32
    scf.if %2 {
      %cst_16 = arith.constant 0.000000e+00 : f32
      %23 = vector.broadcast %cst_16 : f32 to vector<16x128xf32>
      %c0_17 = arith.constant 0 : index
      %c0_18 = arith.constant 0 : index
      %24 = vector.load %arg8[%c0_17, %c0_18] : memref<16x128xf32, #tpu.memory_space<vmem>>, vector<16x128xf32>
      tpu.vector_store %arg8[%c0_17, %c0_18], %23 {strides = array<i32>} : memref<16x128xf32, #tpu.memory_space<vmem>>, vector<16x128xf32>,
    } else {
    }
    %c0 = arith.constant 0 : index
    %c0_1 = arith.constant 0 : index
    %3 = vector.load %arg2[%c0, %c0_1] : memref<16x128xbf16, #tpu.memory_space<vmem>>, vector<16x128xbf16>
    %c0_2 = arith.constant 0 : index
    %c0_3 = arith.constant 0 : index
    %4 = vector.load %arg3[%c0_2, %c0_3] : memref<128x128xbf16, #tpu.memory_space<vmem>>, vector<128x128xbf16>
    %cst = arith.constant dense<0.000000e+00> : vector<16x128xf32>
    %5 = tpu.matmul %3, %4, %cst {dimension_numbers = #tpu.dot_dimension_numbers<[1], [0], [0], [1], [0, 0, 1, 1], [], []>} : vector<16x128xbf16>, vector<128x128xbf16>, vector<16x128xf32> -> vector<16x128xf32>
    %c0_4 = arith.constant 0 : index
    %c0_5 = arith.constant 0 : index
    %6 = vector.load %arg4[%c0_4, %c0_5] : memref<1x128xf32, #tpu.memory_space<vmem>>, vector<1x128xf32>
    %7 = vector.broadcast %6 : vector<1x128xf32> to vector<16x128xf32>
    %8 = arith.addf %5, %7 : vector<16x128xf32>
    %9 = arith.negf %8 : vector<16x128xf32>
    %10 = math.exp %9 : vector<16x128xf32>
    %cst_6 = arith.constant 1.000000e+00 : f32
    %11 = vector.broadcast %cst_6 : f32 to vector<16x128xf32>
    %12 = arith.addf %11, %10 : vector<16x128xf32>
    %13 = arith.divf %11, %12 : vector<16x128xf32>
    %c0_7 = arith.constant 0 : index
    %c0_8 = arith.constant 0 : index
    %14 = vector.load %arg8[%c0_7, %c0_8] : memref<16x128xf32, #tpu.memory_space<vmem>>, vector<16x128xf32>
    %15 = arith.truncf %13 : vector<16x128xf32> to vector<16x128xbf16>
    %c0_9 = arith.constant 0 : index
    %c0_10 = arith.constant 0 : index
    %16 = vector.load %arg5[%c0_9, %c0_10] : memref<128x128xbf16, #tpu.memory_space<vmem>>, vector<128x128xbf16>
    %cst_11 = arith.constant dense<0.000000e+00> : vector<16x128xf32>
    %17 = tpu.matmul %15, %16, %cst_11 {dimension_numbers = #tpu.dot_dimension_numbers<[1], [0], [0], [1], [0, 0, 1, 1], [], []>} : vector<16x128xbf16>, vector<128x128xbf16>, vector<16x128xf32> -> vector<16x128xf32>
    %18 = arith.addf %14, %17 : vector<16x128xf32>
    %c0_12 = arith.constant 0 : index
    %c0_13 = arith.constant 0 : index
    %19 = vector.load %arg8[%c0_12, %c0_13] : memref<16x128xf32, #tpu.memory_space<vmem>>, vector<16x128xf32>
    tpu.vector_store %arg8[%c0_12, %c0_13], %18 {strides = array<i32>} : memref<16x128xf32, #tpu.memory_space<vmem>>, vector<16x128xf32>,
    %c0_i32_14 = arith.constant 0 : i32
    %20 = arith.cmpi eq, %arg1, %c0_i32_14 : i32
    %21 = arith.extui %20 : i1 to i32
    %c0_i32_15 = arith.constant 0 : i32
    %22 = arith.cmpi ne, %21, %c0_i32_15 : i32
    scf.if %22 {
      %c0_16 = arith.constant 0 : index
      %c0_17 = arith.constant 0 : index
      %23 = vector.load %arg8[%c0_16, %c0_17] : memref<16x128xf32, #tpu.memory_space<vmem>>, vector<16x128xf32>
      %24 = vector.extract_strided_slice %23 {offsets = [0, 0], sizes = [16, 3], strides = [1, 1]} : vector<16x128xf32> to vector<16x3xf32>
      %c0_18 = arith.constant 0 : index
      %c0_19 = arith.constant 0 : index
      %25 = vector.load %arg6[%c0_18, %c0_19] : memref<1x3xf32, #tpu.memory_space<vmem>>, vector<1x3xf32>
      %26 = vector.broadcast %25 : vector<1x3xf32> to vector<16x3xf32>
      %27 = arith.addf %24, %26 : vector<16x3xf32>
      %c0_20 = arith.constant 0 : index
      %c0_21 = arith.constant 0 : index
      %28 = vector.load %arg7[%c0_20, %c0_21] : memref<16x3xf32, #tpu.memory_space<vmem>>, vector<16x3xf32>
      tpu.vector_store %arg7[%c0_20, %c0_21], %27 {strides = array<i32>} : memref<16x3xf32, #tpu.memory_space<vmem>>, vector<16x3xf32>,
    } else {
    }
    return
  }
  func.func @transform_0(%arg0: i32, %arg1: i32) -> (i32, i32) {
    %c0_i32 = arith.constant 0 : i32
    %c0_i32_0 = arith.constant 0 : i32
    return %arg0, %c0_i32 : i32, i32
  }
  func.func @transform_1(%arg0: i32, %arg1: i32) -> (i32, i32) {
    %c0_i32 = arith.constant 0 : i32
    %c0_i32_0 = arith.constant 0 : i32
    return %c0_i32, %arg1 : i32, i32
  }
  func.func @transform_2(%arg0: i32, %arg1: i32) -> (i32, i32) {
    %c0_i32 = arith.constant 0 : i32
    %c0_i32_0 = arith.constant 0 : i32
    return %c0_i32, %arg1 : i32, i32
  }
  func.func @transform_3(%arg0: i32, %arg1: i32) -> (i32, i32) {
    %c0_i32 = arith.constant 0 : i32
    %c0_i32_0 = arith.constant 0 : i32
    return %arg1, %c0_i32 : i32, i32
  }
  func.func @transform_4(%arg0: i32, %arg1: i32) -> (i32, i32) {
    %c0_i32 = arith.constant 0 : i32
    %c0_i32_0 = arith.constant 0 : i32
    %c0_i32_1 = arith.constant 0 : i32
    return %c0_i32, %c0_i32_0 : i32, i32
  }
  func.func @transform_5(%arg0: i32, %arg1: i32) -> (i32, i32) {
    %c0_i32 = arith.constant 0 : i32
    %c0_i32_0 = arith.constant 0 : i32
    return %arg0, %c0_i32 : i32, i32
  }
}

</mosaic_0001>

<bundles_post_ra>
// kernel: neural_network_forward.1
= control target key start
LH: loop header
LB: loop body
LE: loop exit
PB: predicated region body
PF: predicated region fallthrough
CT: control target
= control target key end

     0   :  { %10 = vsyncpa [#allocation4], 0  ;;  %s499_s0 = inlined_call_operand.vmem [shape: bf16[16,128], index: 0, kind: input, shape index: {}]   ;;  %s500_s1 = inlined_call_operand.hbm [shape: bf16[128,128], index: 1, kind: input, shape index: {}]   ;;  %s501_s2 = inlined_call_operand.vmem [shape: f32[1,128], index: 2, kind: input, shape index: {}]   ;;  %s502_s3 = inlined_call_operand.hbm [shape: bf16[128,128], index: 3, kind: input, shape index: {}]   ;;  %s503_s4 = inlined_call_operand.vmem [shape: f32[1,3], index: 4, kind: input, shape index: {}]   ;;  %s504_s5 = inlined_call_operand.vmem [shape: f32[16,3], index: 5, kind: output, shape index: {}]  }
   0x1   :  { %s18_s20 = sshll.u32 %s500_s1, 4  ;;  %s19_s20 = int_to_ptr.hbm [resolvable:$true] %s18_s20 }
   0x2   :  { %11 = vsyncpa [#allocation6], 0  ;;  %s444_s21 = smov [#allocation3]   ;;  %s33_s25 = sshll.u32 %s502_s3, 4  ;;  %s34_s25 = int_to_ptr.hbm [resolvable:$true] %s33_s25 }
   0x3   :  { %s20_s22 = sshll.u32 %s444_s21, 4  ;;  %s445_s26 = smov 64   ;;  %s21_s22 = int_to_ptr.vmem [resolvable:$true] %s20_s22 }
   0x4   :  { %s446_s27 = smov 4   ;;  %s447_s28 = smov [#allocation5]  }
   0x5   :  { %26 = dma.hbm_to_vmem [thread:$0]  %s19_s20, 1024, %s21_s22, [#allocation4], %s445_s26, %s445_s26, %s446_s27  }
   0x6   :  { %s35_s29 = sshll.u32 %s447_s28, 4  ;;  %s36_s29 = int_to_ptr.vmem [resolvable:$true] %s35_s29 }
   0x7   :  { %41 = dma.hbm_to_vmem [thread:$0]  %s34_s25, 1024, %s36_s29, [#allocation6], %s445_s26, %s445_s26, %s446_s27  }
   0x8   :  { %440 = dma.done.wait [#allocation4], 1024  }
   0x9   :  { %441 = vsyncadd [#allocation4], 4294966272 }
   0xa   :  { %442 = dma.done.wait [#allocation6], 1024  }
   0xb   :  { %443 = vsyncadd [#allocation6], 4294966272  ;;  %v369_v0 = vld [vmem:[#allocation3 + $0x38] sm:$0xff]  ;;  %v368_v1 = vld [vmem:[#allocation3 + $0x30] sm:$0xff]  ;;  %vm282_vm8 = vcmask 23552  }
   0xc   :  { %134 = vmatpush.bf16.msra.mxu0 %v369_v0  ;;  %v367_v2 = vld [vmem:[#allocation3 + $0x28] sm:$0xff]  ;;  %v366_v3 = vld [vmem:[#allocation3 + $0x20] sm:$0xff]  ;;  %v365_v4 = vld [vmem:[#allocation3 + $0x18] sm:$0xff] }
   0xd   :  { %v364_v5 = vld [vmem:[#allocation3 + $0x10] sm:$0xff]  ;;  %v363_v6 = vld [vmem:[#allocation3 + $0x8] sm:$0xff]  ;;  %v362_v7 = vld [vmem:[#allocation3] sm:$0xff] }
   0xe   :  { %v361_v8 = vld [vmem:[%s499_s0] sm:$0xff]  ;;  %v377_v9 = vld [vmem:[#allocation5 + $0x38] sm:$0xff]  ;;  %v376_v10 = vld [vmem:[#allocation5 + $0x30] sm:$0xff] }
   0xf   :  { %253 = vmatpush.bf16.msra.mxu1 %v377_v9  ;;  %v375_v11 = vld [vmem:[#allocation5 + $0x28] sm:$0xff]  ;;  %v374_v12 = vld [vmem:[#allocation5 + $0x20] sm:$0xff]  ;;  %v373_v13 = vld [vmem:[#allocation5 + $0x18] sm:$0xff] }
  0x10   :  { %135 = vmatpush.bf16.msra.mxu0 %v368_v1  ;;  %v372_v14 = vld [vmem:[#allocation5 + $0x10] sm:$0xff]  ;;  %v382_v15 = vld [vmem:[%s501_s2] ss:$0 sm:$0xff]  ;;  %v371_v16 = vld [vmem:[#allocation5 + $0x8] sm:$0xff] }
  0x11   :  { %v370_v19 = vld [vmem:[#allocation5] sm:$0xff] }
  0x12   :  { %v383_v49 = vld [vmem:[%s503_s4] ss:$0 sm:$0xff] }
  0x13   :  { %254 = vmatpush.bf16.msra.mxu1 %v376_v10 }
  0x14   :  { %136 = vmatpush.bf16.msra.mxu0 %v367_v2 }
  0x17   :  { %255 = vmatpush.bf16.msra.mxu1 %v375_v11 }
  0x18   :  { %137 = vmatpush.bf16.msra.mxu0 %v366_v3 }
  0x1b   :  { %256 = vmatpush.bf16.msra.mxu1 %v374_v12 }
  0x1c   :  { %138 = vmatpush.bf16.msra.mxu0 %v365_v4 }
  0x1f   :  { %257 = vmatpush.bf16.msra.mxu1 %v373_v13 }
  0x20   :  { %139 = vmatpush.bf16.msra.mxu0 %v364_v5 }
  0x23   :  { %258 = vmatpush.bf16.msra.mxu1 %v372_v14 }
  0x24   :  { %140 = vmatpush.bf16.msra.mxu0 %v363_v6 }
  0x27   :  { %259 = vmatpush.bf16.msra.mxu1 %v371_v16 }
  0x28   :  { %141 = vmatpush.bf16.msra.mxu0 %v362_v7 }
  0x2b   :  { %142 = vmatmul.bf16.vlgmr.msra.gmra.mxu0 %v361_v8  ;;  %260 = vmatpush.bf16.msra.mxu1 %v370_v19 }
  0xa8   :  { %v143_v17 = vpop.f32.mrf.mxu0 }
  0xa9   :  { %v144_v18 = vadd.f32 %v382_v15, %v143_v17 }
  0xab   :  { %v327_v20 = vmul.f32 -1.442695, %v144_v18 }
  0xad   :  { %384 = vpow2.f32 %v327_v20 }
  0xb0   :  { %v145_v21 = vpop.f32.mrf.mxu0 }
  0xb1   :  { %v146_v22 = vadd.f32 %v382_v15, %v145_v21 }
  0xb3   :  { %v385_v23 = vpop.eup %384  ;;  %v328_v24 = vmul.f32 -1.442695, %v146_v22 }
  0xb4   :  { %v154_v25 = vadd.f32 1.0, %v385_v23 }
  0xb5   :  { %386 = vpow2.f32 %v328_v24 }
  0xb6   :  { %388 = vrcp.f32 %v154_v25  ;;  %vm161_vm1 = vweird.f32 %v154_v25  ;;  %v167_v36 = vand.u32 2147483648, %v154_v25  ;;  %v165_v38 = vand.u32 2147483647, %v154_v25 }
  0xb8   :  { %v168_v43 = vor.u32 1.1754944e-38, %v167_v36  ;;  %vm166_vm6 = vcmp.eq.f32.partialorder %v165_v38, 8.507059e+37 }
  0xbb   :  { %v387_v26 = vpop.eup %386 }
  0xbc   :  { %v389_v27 = vpop.eup %388  ;;  %v155_v28 = vadd.f32 1.0, %v387_v26 }
  0xbd   :  { %v157_v29 = vmul.f32 %v389_v27, %v154_v25  ;;  %vm162_vm0 = vweird.f32 %v389_v27 }
  0xbe   :  { %390 = vrcp.f32 %v155_v28  ;;  %v182_v37 = vand.u32 2147483648, %v155_v28  ;;  %v180_v40 = vand.u32 2147483647, %v155_v28  ;;  %vm163_vm3 = vmor %vm161_vm1, %vm162_vm0  ;;  %vm176_vm4 = vweird.f32 %v155_v28 }
  0xbf   :  { %v158_v30 = vsub.f32 1.0, %v157_v29 }
  0xc0   :  { %v183_v44 = vor.u32 1.1754944e-38, %v182_v37  ;;  %vm181_vm7 = vcmp.eq.f32.partialorder %v180_v40, 8.507059e+37 }
  0xc1   :  { %v159_v31 = vmul.f32 %v389_v27, %v158_v30 }
  0xc3   :  { %v160_v34 = vadd.f32 %v389_v27, %v159_v31 }
  0xc4   :  { %v391_v32 = vpop.eup %390 }
  0xc5   :  { %v172_v33 = vmul.f32 %v391_v32, %v155_v28  ;;  %vm177_vm2 = vweird.f32 %v391_v32  ;;  %v164_v41 = vsel %vm163_vm3, %v389_v27, %v160_v34 }
  0xc6   :  { %vm178_vm5 = vmor %vm176_vm4, %vm177_vm2  ;;  %v169_v46 = vsel %vm166_vm6, %v168_v43, %v164_v41 }
  0xc7   :  { %v173_v35 = vsub.f32 1.0, %v172_v33 }
  0xc9   :  { %v174_v39 = vmul.f32 %v391_v32, %v173_v35 }
  0xcb   :  { %v175_v42 = vadd.f32 %v391_v32, %v174_v39 }
  0xcd   :  { %v179_v45 = vsel %vm178_vm5, %v391_v32, %v175_v42 }
  0xce   :  { %v184_v47 = vsel %vm181_vm7, %v183_v44, %v179_v45 }
  0xcf   :  { %v188_v48 = vpack.c.bf16 %v184_v47, %v169_v46 }
  0xd1   :  { %261 = vmatmul.bf16.vlgmr.msra.gmra.mxu1 %v188_v48 }
 0x14e   :  { %v262_v50 = vpop.f32.mrf.mxu1 }
 0x14f   :  { %v280_v51 = vadd.f32 %v383_v49, %v262_v50 }
 0x151   :  { %283 = vst.msk [vmem:[%s504_s5] sm:$0xff] %vm282_vm8, %v280_v51 }
 0x156   :  { %v264_v52 = vpop.f32.mrf.mxu1 }
 0x157   :  { %v281_v53 = vadd.f32 %v383_v49, %v264_v52 }
 0x159   :  { %284 = vst.msk [vmem:[%s504_s5 + $0x8] sm:$0xff] %vm282_vm8, %v281_v53 }
 0x15a   :  { %289 = vsyncpa [#allocation4], 1 }
 0x15b   :  { %290 = vsyncpa [#allocation6], 1 }

</bundles_post_ra>
